<compile_context>
chip_gen: v7x
topology: tpu7x:2x2x1
jax: 0.10.0
libtpu: 0.0.40
codegen_flags: <defaults>
</compile_context>

<pallas_src>
import jax
import jax.numpy as jnp
from jax.experimental import pallas as pl
from jax.experimental.pallas import tpu as pltpu


def _make_leaky_relu_kernel(negative_slope: float):
    slope = float(negative_slope)

    def kernel(x_ref, o_ref):
        x = x_ref[...]
        # Compute the negative branch in f32 (matches torch opmath for bf16/half),
        # then cast back to the storage dtype. For f32 inputs the casts are no-ops.
        neg = (x.astype(jnp.float32) * slope).astype(x.dtype)
        o_ref[...] = jnp.where(x > 0, x, neg)

    return kernel


def leaky_relu(x: jax.Array, negative_slope: float = 0.01) -> jax.Array:
    """LeakyReLU forward: where(x > 0, x, x * negative_slope)."""
    orig_shape = x.shape
    n = x.size
    if n == 0:
        return x

    # Pick the widest lane dimension that exactly divides the element count so
    # we can view the tensor as a 2D slab with no padding and no final slice.
    lanes = None
    for cand in (1024, 512, 256, 128):
        if n % cand == 0:
            lanes = cand
            break
    if lanes is None:
        # Element count not a multiple of 128: elementwise op, let XLA handle it.
        # TODO(synk): 1D partial-block Pallas path for non-multiple-of-128 sizes.
        neg = (x.astype(jnp.float32) * negative_slope).astype(x.dtype)
        return jnp.where(x > 0, x, neg)

    rows = n // lanes
    x2d = x.reshape(rows, lanes)  # pure reshape of a contiguous array: no copy

    # Target ~4 MiB per block buffer; with default double buffering this is
    # ~16 MiB of scoped VMEM (2 in + 2 out), covered by vmem_limit_bytes below.
    itemsize = jnp.dtype(x.dtype).itemsize
    target_bytes = 4 * 1024 * 1024
    block_rows = max(8, (target_bytes // (lanes * itemsize)) // 8 * 8)
    # Don't allocate a block far larger than the whole input (small-input case).
    block_rows = min(block_rows, ((rows + 7) // 8) * 8)

    grid = (pl.cdiv(rows, block_rows),)

    out2d = pl.pallas_call(
        _make_leaky_relu_kernel(negative_slope),
        out_shape=jax.ShapeDtypeStruct((rows, lanes), x.dtype),
        grid=grid,
        in_specs=[pl.BlockSpec((block_rows, lanes), lambda i: (i, 0))],
        out_specs=pl.BlockSpec((block_rows, lanes), lambda i: (i, 0)),
        compiler_params=pltpu.CompilerParams(
            dimension_semantics=("parallel",),
            vmem_limit_bytes=32 * 1024 * 1024,
        ),
    )(x2d)

    return out2d.reshape(orig_shape)


if __name__ == "__main__":
    key = jax.random.PRNGKey(0)
    # NCHW input, small GAN-like feature map: batch=2, channels=4, 16x16 spatial.
    x = jax.random.normal(key, (2, 4, 16, 16), dtype=jnp.float32)

    neg_slope = 0.01
    y = leaky_relu(x, neg_slope)
    y = jax.block_until_ready(y)

    # Reference check against plain JAX (matches torch.where semantics).
    y_ref = jnp.where(x > 0, x, x * neg_slope)
    assert y.shape == x.shape and y.dtype == x.dtype
    assert jnp.allclose(y, y_ref), "mismatch vs reference"

    print("KERNEL_OK")
</pallas_src>

<mosaic_0001>
module attributes {stable_mosaic.version = 11 : i64} {
  func.func @kernel(%arg0: i32, %arg1: memref<8x1024xf32, #tpu.memory_space<vmem>>, %arg2: memref<8x1024xf32, #tpu.memory_space<vmem>>) attributes {dimension_semantics = [#tpu.dimension_semantics<parallel>], iteration_bounds = array<i64: 1>, scalar_prefetch = 0 : i64, scratch_operands = 0 : i64, tpu.core_type = #tpu.core_type<tc>, window_params = [{transform_indices = @transform_0, window_bounds = array<i64: 8, 1024>}, {transform_indices = @transform_1, window_bounds = array<i64: 8, 1024>}]} {
    %c0 = arith.constant 0 : index
    %c0_0 = arith.constant 0 : index
    %0 = vector.load %arg1[%c0, %c0_0] : memref<8x1024xf32, #tpu.memory_space<vmem>>, vector<8x1024xf32>
    %cst = arith.constant 0.00999999977 : f32
    %1 = vector.broadcast %cst : f32 to vector<8x1024xf32>
    %2 = arith.mulf %0, %1 : vector<8x1024xf32>
    %cst_1 = arith.constant 0.000000e+00 : f32
    %3 = vector.broadcast %cst_1 : f32 to vector<8x1024xf32>
    %4 = arith.cmpf ogt, %0, %3 : vector<8x1024xf32>
    %5 = arith.select %4, %0, %2 : vector<8x1024xi1>, vector<8x1024xf32>
    %c0_2 = arith.constant 0 : index
    %c0_3 = arith.constant 0 : index
    %6 = vector.load %arg2[%c0_2, %c0_3] : memref<8x1024xf32, #tpu.memory_space<vmem>>, vector<8x1024xf32>
    tpu.vector_store %arg2[%c0_2, %c0_3], %5 {strides = array<i32>} : memref<8x1024xf32, #tpu.memory_space<vmem>>, vector<8x1024xf32>,
    return
  }
  func.func @transform_0(%arg0: i32) -> (i32, i32) {
    %c0_i32 = arith.constant 0 : i32
    %c0_i32_0 = arith.constant 0 : i32
    return %arg0, %c0_i32 : i32, i32
  }
  func.func @transform_1(%arg0: i32) -> (i32, i32) {
    %c0_i32 = arith.constant 0 : i32
    %c0_i32_0 = arith.constant 0 : i32
    return %arg0, %c0_i32 : i32, i32
  }
}

</mosaic_0001>

<bundles_post_ra>
// kernel: tpu_custom_call.1
= control target key start
LH: loop header
LB: loop body
LE: loop exit
PB: predicated region body
PF: predicated region fallthrough
CT: control target
= control target key end

     0   :  { %6 = vsyncpa [#allocation3], 0  ;;  %s176_s0 = inlined_call_operand.hbm [shape: f32[2,1024], index: 0, kind: input, shape index: {}]   ;;  %s177_s1 = inlined_call_operand.hbm [shape: f32[2,1024], index: 1, kind: output, shape index: {}]  }
   0x1   :  { %7 = vsyncpa [#allocation4], 0 }
   0x2   :  { %12 = vsyncadd [#allocation3], 768  ;;  %s132_s6 = smov [#allocation2]   ;;  %s84_s10 = scalar_lea.hbm %s176_s0, 256 }
   0x3   :  { %s13_s7 = sshll.u32 %s132_s6, 4  ;;  %p85_p0 = scmp.ne.s32.totalorder %s176_s0, %s84_s10  ;;  %s14_s7 = int_to_ptr.vmem [resolvable:$true] %s13_s7 }
   0x4   :  { %p88_p1 = scmp.lt.u32.totalorder %s84_s10, %s176_s0 }
   0x6   :  { %p90_p2 = pnand %p88_p1, %p85_p0 }
   0x8   :  { %93 = shalt.err (!%p90_p2)
}
   0x9   :  { %s94_s15 = scalar_lea.vmem %s14_s7, 256  ;;  %s98_s16 = scalar_lea.vmem %s14_s7, 1024 }
   0xa   :  { %p95_p3 = scmp.ne.s32.totalorder %s14_s7, %s94_s15  ;;  %p99_p4 = scmp.lt.s32.totalorder %s14_s7, %s14_s7 }
   0xb   :  { %p100_p5 = scmp.lt.s32.totalorder %s98_s16, %s94_s15 }
   0xd   :  { %p101_p6 = por %p100_p5, %p99_p4 }
   0xf   :  { %p102_p7 = pnand %p101_p6, %p95_p3 }
  0x11   :  { %105 = shalt.err (!%p102_p7)
}
  0x12   :  { %s133_s17 = smov 256   ;;  %s134_s18 = smov 16  }
  0x13   :  { %19 = dma.hbm_to_vmem [thread:$0]  %s176_s0, 256, %s14_s7, [#allocation3], %s133_s17, %s133_s17, %s134_s18  }
  0x14   :  { %128 = dma.done.wait [#allocation3], 1024  }
  0x15   :  { %129 = vsyncadd [#allocation3], 4294966272  ;;  %v23_v0 = vld [vmem:[#allocation2] sm:$0xff]  ;;  %v24_v1 = vld [vmem:[#allocation2 + $0x8] sm:$0xff] }
  0x16   :  { %v25_v2 = vld [vmem:[#allocation2 + $0x10] sm:$0xff]  ;;  %v31_v3 = vmul.f32 0.01, %v23_v0  ;;  %vm39_vm0 = vcmp.gt.f32.partialorder %v23_v0, 0.0  ;;  %v32_v4 = vmul.f32 0.01, %v24_v1 }
  0x17   :  { %vm40_vm1 = vcmp.gt.f32.partialorder %v24_v1, 0.0  ;;  %v33_v5 = vmul.f32 0.01, %v25_v2  ;;  %vm41_vm2 = vcmp.gt.f32.partialorder %v25_v2, 0.0  ;;  %v26_v6 = vld [vmem:[#allocation2 + $0x18] sm:$0xff]  ;;  %v27_v7 = vld [vmem:[#allocation2 + $0x20] sm:$0xff] }
  0x18   :  { %v28_v8 = vld [vmem:[#allocation2 + $0x28] sm:$0xff]  ;;  %v47_v9 = vsel %vm39_vm0, %v23_v0, %v31_v3  ;;  %v48_v10 = vsel %vm40_vm1, %v24_v1, %v32_v4  ;;  %v34_v11 = vmul.f32 0.01, %v26_v6  ;;  %vm42_vm3 = vcmp.gt.f32.partialorder %v26_v6, 0.0  ;;  %v29_v12 = vld [vmem:[#allocation2 + $0x30] sm:$0xff]  ;;  %v30_v13 = vld [vmem:[#allocation2 + $0x38] sm:$0xff] }
  0x19   :  { %55 = vst [vmem:[#allocation5] sm:$0xff] %v47_v9  ;;  %56 = vst [vmem:[#allocation5 + $0x8] sm:$0xff] %v48_v10  ;;  %v49_v14 = vsel %vm41_vm2, %v25_v2, %v33_v5  ;;  %v35_v15 = vmul.f32 0.01, %v27_v7  ;;  %vm43_vm4 = vcmp.gt.f32.partialorder %v27_v7, 0.0  ;;  %vm44_vm5 = vcmp.gt.f32.partialorder %v28_v8, 0.0 }
  0x1a   :  { %v36_v16 = vmul.f32 0.01, %v28_v8  ;;  %57 = vst [vmem:[#allocation5 + $0x10] sm:$0xff] %v49_v14  ;;  %v50_v17 = vsel %vm42_vm3, %v26_v6, %v34_v11  ;;  %v37_v18 = vmul.f32 0.01, %v29_v12  ;;  %vm45_vm6 = vcmp.gt.f32.partialorder %v29_v12, 0.0 }
  0x1b   :  { %58 = vst [vmem:[#allocation5 + $0x18] sm:$0xff] %v50_v17  ;;  %v51_v19 = vsel %vm43_vm4, %v27_v7, %v35_v15  ;;  %v38_v21 = vmul.f32 0.01, %v30_v13  ;;  %vm46_vm7 = vcmp.gt.f32.partialorder %v30_v13, 0.0 }
  0x1c   :  { %v52_v20 = vsel %vm44_vm5, %v28_v8, %v36_v16  ;;  %59 = vst [vmem:[#allocation5 + $0x20] sm:$0xff] %v51_v19  ;;  %v53_v22 = vsel %vm45_vm6, %v29_v12, %v37_v18 }
  0x1d   :  { %60 = vst [vmem:[#allocation5 + $0x28] sm:$0xff] %v52_v20  ;;  %61 = vst [vmem:[#allocation5 + $0x30] sm:$0xff] %v53_v22  ;;  %v54_v23 = vsel %vm46_vm7, %v30_v13, %v38_v21 }
  0x1e   :  { %62 = vst [vmem:[#allocation5 + $0x38] sm:$0xff] %v54_v23 }
  0x1f   :  { %67 = vsyncadd [#allocation4], 768  ;;  %s135_s0 = smov [#allocation5]  }
  0x20   :  { %s68_s21 = sshll.u32 %s135_s0, 4  ;;  %s69_s21 = int_to_ptr.vmem [resolvable:$true] %s68_s21 }
  0x21   :  { %s106_s22 = scalar_lea.vmem %s69_s21, 256  ;;  %s110_s23 = scalar_lea.vmem %s69_s21, 1024 }
  0x22   :  { %p107_p8 = scmp.ne.s32.totalorder %s69_s21, %s106_s22  ;;  %p111_p9 = scmp.lt.s32.totalorder %s69_s21, %s69_s21 }
  0x23   :  { %p112_p10 = scmp.lt.s32.totalorder %s110_s23, %s106_s22 }
  0x25   :  { %p113_p11 = por %p112_p10, %p111_p9 }
  0x27   :  { %p114_p12 = pnand %p113_p11, %p107_p8 }
  0x29   :  { %117 = shalt.err (!%p114_p12)
}
  0x2a   :  { %s118_s26 = scalar_lea.hbm %s177_s1, 256 }
  0x2b   :  { %p119_p13 = scmp.ne.s32.totalorder %s177_s1, %s118_s26  ;;  %p122_p0 = scmp.lt.u32.totalorder %s118_s26, %s177_s1 }
  0x2d   :  { %p124_p1 = pnand %p122_p0, %p119_p13 }
  0x2f   :  { %127 = shalt.err (!%p124_p1)
}
  0x30   :  { %74 = dma.vmem_to_hbm [thread:$0]  %s69_s21, 256, %s177_s1, [#allocation4], %s133_s17, %s133_s17, %s134_s18  }
  0x31   :  { %130 = dma.done.wait [#allocation4], 1024  }
  0x32   :  { %131 = vsyncadd [#allocation4], 4294966272 }
  0x33   :  { %78 = vsyncpa [#allocation3], 1 }
  0x34   :  { %79 = vsyncpa [#allocation4], 1 }

</bundles_post_ra>
